<compile_context>
chip_gen: v7x
topology: tpu7x:2x2x1
jax: 0.10.0
libtpu: 0.0.40
codegen_flags: <defaults>
</compile_context>

<pallas_src>
import functools

import numpy as np
import jax
import jax.numpy as jnp
from jax import lax
from jax.experimental import pallas as pl
from jax.experimental.pallas import tpu as pltpu


def _relu_conv_bn_kernel(x_ref, w_ref, ss_ref, o_ref, xpad_ref, *,
                         kh, stride, pad, H, Ho):
    # x_ref:    (1, H, W*C_in)          f32  unpadded image, NHWC rows flattened as (W*C_in)
    # w_ref:    (kh, W*C_in, Wo*C_out)  bf16 width-banded conv weight (pad + stride baked in)
    # ss_ref:   (2, Wo*C_out)           f32  row 0: BN scale (tiled over Wo), row 1: BN shift
    # o_ref:    (1, Ho, Wo*C_out)       f32  lane-dense output
    # xpad_ref: (Hp, W*C_in)            f32  VMEM scratch: height-padded, ReLU'd activation

    # Fused height-pad + ReLU (once per image, not per tap).
    xpad_ref[...] = jnp.zeros_like(xpad_ref)
    xpad_ref[pad:pad + H, :] = jnp.maximum(x_ref[0], 0.0)

    # Single bf16 cast of the resident block (MXU operand dtype).
    xpad = xpad_ref[...].astype(jnp.bfloat16)            # (Hp, W*C_in)

    scale = ss_ref[0:1, :]                                # (1, Wo*C_out)
    shift = ss_ref[1:2, :]

    acc = jnp.zeros(o_ref.shape[1:], jnp.float32)         # (Ho, Wo*C_out) ~ 2 vregs
    for i in range(kh):                                    # static unroll: kh matmuls
        if stride == 1:
            lhs = xpad[i:i + Ho, :]                        # contiguous row window
        else:
            lhs = lax.slice(xpad, (i, 0),
                            (i + (Ho - 1) * stride + 1, xpad.shape[1]),
                            (stride, 1))
        # (Ho, W*C_in) @ (W*C_in, Wo*C_out): K=W*C_in, N=Wo*C_out, f32 accumulate.
        acc = acc + jnp.dot(lhs, w_ref[i], preferred_element_type=jnp.float32)

    # BN epilogue in f32 (scale kept out of the bf16 weight for precision).
    o_ref[0] = acc * scale + shift


@functools.partial(jax.jit, static_argnames=("stride", "padding", "eps"))
def relu_conv_bn(x_nchw, conv_w, gamma, beta, run_mean, run_var,
                 *, stride=1, padding=1, eps=1e-5):
    """ReLU -> Conv2d(bias=False) -> BatchNorm2d (eval mode, running stats), fused."""
    N, C_in, H, W = x_nchw.shape
    C_out, _, kh, kw = conv_w.shape
    Hp = H + 2 * padding
    Ho = (H + 2 * padding - kh) // stride + 1
    Wo = (W + 2 * padding - kw) // stride + 1

    # ---- host-side weight prep (tiny, done once under jit) -------------------
    # w_band[i, wi*C_in + c, x*C_out + o] = conv_w[o, c, i, j]
    #   where wi == x*stride + j - padding and 0 <= wi < W (else the tap hits the
    #   zero pad and is simply absent from the band).
    S = np.zeros((kw, W, Wo), np.float32)
    for j in range(kw):
        for x in range(Wo):
            wi = x * stride + j - padding
            if 0 <= wi < W:
                S[j, wi, x] = 1.0
    w_band = jnp.einsum("ocij,jwx->iwcxo", conv_w.astype(jnp.float32), S)
    w_band = w_band.reshape(kh, W * C_in, Wo * C_out).astype(jnp.bfloat16)

    # BN (eval): per-channel scale/shift, tiled over Wo to match the
    # (Ho, Wo*C_out) output layout; applied in f32 inside the kernel epilogue.
    scale = gamma.astype(jnp.float32) / jnp.sqrt(run_var.astype(jnp.float32) + eps)
    shift = beta.astype(jnp.float32) - run_mean.astype(jnp.float32) * scale
    ss = jnp.stack([jnp.tile(scale, Wo), jnp.tile(shift, Wo)])        # (2, Wo*C_out)

    # Single NHWC relayout of the f32 input; pad / ReLU / bf16-cast are in-kernel.
    x_rows = jnp.transpose(x_nchw, (0, 2, 3, 1)).reshape(N, H, W * C_in)
    x_rows = x_rows.astype(jnp.float32)

    kernel = functools.partial(_relu_conv_bn_kernel,
                               kh=kh, stride=stride, pad=padding, H=H, Ho=Ho)

    out = pl.pallas_call(
        kernel,
        out_shape=jax.ShapeDtypeStruct((N, Ho, Wo * C_out), jnp.float32),
        grid_spec=pltpu.PrefetchScalarGridSpec(
            num_scalar_prefetch=0,
            grid=(N,),
            in_specs=[
                pl.BlockSpec((1, H, W * C_in), lambda n: (n, 0, 0)),
                pl.BlockSpec((kh, W * C_in, Wo * C_out), lambda n: (0, 0, 0)),
                pl.BlockSpec((2, Wo * C_out), lambda n: (0, 0)),
            ],
            out_specs=pl.BlockSpec((1, Ho, Wo * C_out), lambda n: (n, 0, 0)),
            scratch_shapes=[pltpu.VMEM((Hp, W * C_in), jnp.float32)],
        ),
        compiler_params=pltpu.CompilerParams(dimension_semantics=("parallel",)),
    )(x_rows, w_band, ss)

    # (N, Ho, Wo*C_out) -> NCHW. Reshape is free; one transpose (module API is NCHW).
    out = out.reshape(N, Ho, Wo, C_out)
    return jnp.transpose(out, (0, 3, 1, 2))


def _reference(x_nchw, conv_w, gamma, beta, run_mean, run_var, *, stride, padding, eps=1e-5):
    x = jnp.maximum(x_nchw, 0.0)
    y = jax.lax.conv_general_dilated(
        x.astype(jnp.float32), conv_w.astype(jnp.float32),
        window_strides=(stride, stride),
        padding=[(padding, padding), (padding, padding)],
        dimension_numbers=("NCHW", "OIHW", "NCHW"),
    )
    s = gamma / jnp.sqrt(run_var + eps)
    return y * s[None, :, None, None] + (beta - run_mean * s)[None, :, None, None]


if __name__ == "__main__":
    # ReLUConvBN(C_in=4, C_out=8, kernel_size=3, stride=1, padding=1, affine=True)
    N, C_in, H, W = 2, 4, 16, 16
    C_out, kh, kw = 8, 3, 3
    stride, padding = 1, 1

    key = jax.random.PRNGKey(0)
    kx, kw_, kg, kb, km, kv = jax.random.split(key, 6)

    x = jax.random.normal(kx, (N, C_in, H, W), dtype=jnp.float32)
    conv_w = jax.random.normal(kw_, (C_out, C_in, kh, kw), dtype=jnp.float32) * 0.1
    gamma = 1.0 + 0.1 * jax.random.normal(kg, (C_out,), dtype=jnp.float32)
    beta = 0.1 * jax.random.normal(kb, (C_out,), dtype=jnp.float32)
    run_mean = 0.05 * jax.random.normal(km, (C_out,), dtype=jnp.float32)
    run_var = 0.5 + jnp.abs(jax.random.normal(kv, (C_out,), dtype=jnp.float32)) * 0.5

    out = relu_conv_bn(x, conv_w, gamma, beta, run_mean, run_var,
                       stride=stride, padding=padding)
    out = jax.block_until_ready(out)

    ref = _reference(x, conv_w, gamma, beta, run_mean, run_var,
                     stride=stride, padding=padding)
    assert out.shape == (N, C_out, H, W)
    # bf16 MXU operands (f32 accumulate, f32 BN epilogue) -> modest tolerance.
    assert jnp.allclose(out, ref, atol=5e-2, rtol=5e-2), "mismatch vs reference"

    print("KERNEL_OK")
</pallas_src>

<mosaic_0001>
module attributes {stable_mosaic.version = 11 : i64} {
  func.func @_relu_conv_bn_kernel(%arg0: i32, %arg1: memref<1x16x64xf32, #tpu.memory_space<vmem>>, %arg2: memref<3x64x128xbf16, #tpu.memory_space<vmem>>, %arg3: memref<2x128xf32, #tpu.memory_space<vmem>>, %arg4: memref<1x16x128xf32, #tpu.memory_space<vmem>>, %arg5: memref<18x64xf32, #tpu.memory_space<vmem>>) attributes {dimension_semantics = [#tpu.dimension_semantics<parallel>], iteration_bounds = array<i64: 2>, scalar_prefetch = 0 : i64, scratch_operands = 1 : i64, tpu.core_type = #tpu.core_type<tc>, window_params = [{transform_indices = @transform_0, window_bounds = array<i64: 1, 16, 64>}, {pipeline_mode = #tpu.pipeline_mode<synchronous>, transform_indices = @transform_1, window_bounds = array<i64: 3, 64, 128>}, {pipeline_mode = #tpu.pipeline_mode<synchronous>, transform_indices = @transform_2, window_bounds = array<i64: 2, 128>}, {transform_indices = @transform_3, window_bounds = array<i64: 1, 16, 128>}]} {
    %cst = arith.constant 0.000000e+00 : f32
    %0 = vector.broadcast %cst : f32 to vector<18x64xf32>
    %c0 = arith.constant 0 : index
    %c0_0 = arith.constant 0 : index
    %1 = vector.load %arg5[%c0, %c0_0] : memref<18x64xf32, #tpu.memory_space<vmem>>, vector<18x64xf32>
    tpu.vector_store %arg5[%c0, %c0_0], %0 {strides = array<i32>} : memref<18x64xf32, #tpu.memory_space<vmem>>, vector<18x64xf32>,
    %c0_1 = arith.constant 0 : index
    %c0_2 = arith.constant 0 : index
    %c0_3 = arith.constant 0 : index
    %2 = vector.load %arg1[%c0_1, %c0_2, %c0_3] : memref<1x16x64xf32, #tpu.memory_space<vmem>>, vector<1x16x64xf32>
    %3 = vector.shape_cast %2 : vector<1x16x64xf32> to vector<16x64xf32>
    %cst_4 = arith.constant 0.000000e+00 : f32
    %4 = vector.broadcast %cst_4 : f32 to vector<16x64xf32>
    %5 = arith.maximumf %3, %4 : vector<16x64xf32>
    %c1 = arith.constant 1 : index
    %c0_5 = arith.constant 0 : index
    %6 = vector.load %arg5[%c1, %c0_5] : memref<18x64xf32, #tpu.memory_space<vmem>>, vector<16x64xf32>
    tpu.vector_store %arg5[%c1, %c0_5], %5 {strides = array<i32>} : memref<18x64xf32, #tpu.memory_space<vmem>>, vector<16x64xf32>,
    %c0_6 = arith.constant 0 : index
    %c0_7 = arith.constant 0 : index
    %7 = vector.load %arg5[%c0_6, %c0_7] : memref<18x64xf32, #tpu.memory_space<vmem>>, vector<18x64xf32>
    %8 = arith.truncf %7 : vector<18x64xf32> to vector<18x64xbf16>
    %c0_8 = arith.constant 0 : index
    %c0_9 = arith.constant 0 : index
    %9 = vector.load %arg3[%c0_8, %c0_9] : memref<2x128xf32, #tpu.memory_space<vmem>>, vector<1x128xf32>
    %c1_10 = arith.constant 1 : index
    %c0_11 = arith.constant 0 : index
    %10 = vector.load %arg3[%c1_10, %c0_11] : memref<2x128xf32, #tpu.memory_space<vmem>>, vector<1x128xf32>
    %cst_12 = arith.constant 0.000000e+00 : f32
    %11 = vector.broadcast %cst_12 : f32 to vector<16x128xf32>
    %12 = vector.extract_strided_slice %8 {offsets = [0, 0], sizes = [16, 64], strides = [1, 1]} : vector<18x64xbf16> to vector<16x64xbf16>
    %c0_13 = arith.constant 0 : index
    %c0_14 = arith.constant 0 : index
    %c0_15 = arith.constant 0 : index
    %13 = vector.load %arg2[%c0_13, %c0_14, %c0_15] : memref<3x64x128xbf16, #tpu.memory_space<vmem>>, vector<1x64x128xbf16>
    %14 = vector.shape_cast %13 : vector<1x64x128xbf16> to vector<64x128xbf16>
    %cst_16 = arith.constant dense<0.000000e+00> : vector<16x128xf32>
    %15 = tpu.matmul %12, %14, %cst_16 {dimension_numbers = #tpu.dot_dimension_numbers<[1], [0], [0], [1], [0, 0, 1, 1], [], []>} : vector<16x64xbf16>, vector<64x128xbf16>, vector<16x128xf32> -> vector<16x128xf32>
    %16 = arith.addf %11, %15 : vector<16x128xf32>
    %17 = vector.extract_strided_slice %8 {offsets = [1, 0], sizes = [16, 64], strides = [1, 1]} : vector<18x64xbf16> to vector<16x64xbf16>
    %c1_17 = arith.constant 1 : index
    %c0_18 = arith.constant 0 : index
    %c0_19 = arith.constant 0 : index
    %18 = vector.load %arg2[%c1_17, %c0_18, %c0_19] : memref<3x64x128xbf16, #tpu.memory_space<vmem>>, vector<1x64x128xbf16>
    %19 = vector.shape_cast %18 : vector<1x64x128xbf16> to vector<64x128xbf16>
    %cst_20 = arith.constant dense<0.000000e+00> : vector<16x128xf32>
    %20 = tpu.matmul %17, %19, %cst_20 {dimension_numbers = #tpu.dot_dimension_numbers<[1], [0], [0], [1], [0, 0, 1, 1], [], []>} : vector<16x64xbf16>, vector<64x128xbf16>, vector<16x128xf32> -> vector<16x128xf32>
    %21 = arith.addf %16, %20 : vector<16x128xf32>
    %22 = vector.extract_strided_slice %8 {offsets = [2, 0], sizes = [16, 64], strides = [1, 1]} : vector<18x64xbf16> to vector<16x64xbf16>
    %c2 = arith.constant 2 : index
    %c0_21 = arith.constant 0 : index
    %c0_22 = arith.constant 0 : index
    %23 = vector.load %arg2[%c2, %c0_21, %c0_22] : memref<3x64x128xbf16, #tpu.memory_space<vmem>>, vector<1x64x128xbf16>
    %24 = vector.shape_cast %23 : vector<1x64x128xbf16> to vector<64x128xbf16>
    %cst_23 = arith.constant dense<0.000000e+00> : vector<16x128xf32>
    %25 = tpu.matmul %22, %24, %cst_23 {dimension_numbers = #tpu.dot_dimension_numbers<[1], [0], [0], [1], [0, 0, 1, 1], [], []>} : vector<16x64xbf16>, vector<64x128xbf16>, vector<16x128xf32> -> vector<16x128xf32>
    %26 = arith.addf %21, %25 : vector<16x128xf32>
    %27 = vector.broadcast %9 : vector<1x128xf32> to vector<16x128xf32>
    %28 = arith.mulf %26, %27 : vector<16x128xf32>
    %29 = vector.broadcast %10 : vector<1x128xf32> to vector<16x128xf32>
    %30 = arith.addf %28, %29 : vector<16x128xf32>
    %c0_24 = arith.constant 0 : index
    %c0_25 = arith.constant 0 : index
    %c0_26 = arith.constant 0 : index
    %31 = vector.load %arg4[%c0_24, %c0_25, %c0_26] : memref<1x16x128xf32, #tpu.memory_space<vmem>>, vector<1x16x128xf32>
    %32 = vector.shape_cast %31 : vector<1x16x128xf32> to vector<16x128xf32>
    %33 = vector.shape_cast %30 : vector<16x128xf32> to vector<1x16x128xf32>
    tpu.vector_store %arg4[%c0_24, %c0_25, %c0_26], %33 {strides = array<i32>} : memref<1x16x128xf32, #tpu.memory_space<vmem>>, vector<1x16x128xf32>,
    return
  }
  func.func @transform_0(%arg0: i32) -> (i32, i32, i32) {
    %c0_i32 = arith.constant 0 : i32
    %c0_i32_0 = arith.constant 0 : i32
    %c0_i32_1 = arith.constant 0 : i32
    return %arg0, %c0_i32, %c0_i32_0 : i32, i32, i32
  }
  func.func @transform_1(%arg0: i32) -> (i32, i32, i32) {
    %c0_i32 = arith.constant 0 : i32
    %c0_i32_0 = arith.constant 0 : i32
    %c0_i32_1 = arith.constant 0 : i32
    %c0_i32_2 = arith.constant 0 : i32
    return %c0_i32, %c0_i32_0, %c0_i32_1 : i32, i32, i32
  }
  func.func @transform_2(%arg0: i32) -> (i32, i32) {
    %c0_i32 = arith.constant 0 : i32
    %c0_i32_0 = arith.constant 0 : i32
    %c0_i32_1 = arith.constant 0 : i32
    return %c0_i32, %c0_i32_0 : i32, i32
  }
  func.func @transform_3(%arg0: i32) -> (i32, i32, i32) {
    %c0_i32 = arith.constant 0 : i32
    %c0_i32_0 = arith.constant 0 : i32
    %c0_i32_1 = arith.constant 0 : i32
    return %arg0, %c0_i32, %c0_i32_0 : i32, i32, i32
  }
}

</mosaic_0001>

<bundles_post_ra>
// kernel: tile.13
= control target key start
LH: loop header
LB: loop body
LE: loop exit
PB: predicated region body
PF: predicated region fallthrough
CT: control target
= control target key end

     0   :  { %s28_s0 = inlined_call_operand.vmem [shape: f32[8], index: 0, kind: input, shape index: {}]   ;;  %s29_s1 = inlined_call_operand.vmem [shape: f32[16,8], index: 1, kind: output, shape index: {}]  }
   0x1   :  { %v4_v0 = vld [vmem:[%s28_s0] ss:$0 sm:$0xff] }
   0x2   :  { %5 = vst [vmem:[%s29_s1] sm:$0xff] %v4_v0  ;;  %8 = vst [vmem:[%s29_s1 + $0x8] sm:$0xff] %v4_v0 }

// kernel: tile.18
= control target key start
LH: loop header
LB: loop body
LE: loop exit
PB: predicated region body
PF: predicated region fallthrough
CT: control target
= control target key end

     0   :  { %s131_s10 = smov 120   ;;  %s132_s11 = smov 104   ;;  %vm3_vm0 = vcmask 64512   ;;  %vm9_vm1 = vcmask 1048512   ;;  %vm15_vm2 = vcmask 982912   ;;  %vm21_vm3 = vcmask 917312   ;;  %s207_s0 = inlined_call_operand.vmem [shape: f32[16,8], index: 0, kind: input, shape index: {}]   ;;  %s208_s1 = inlined_call_operand.vmem [shape: f32[1,128], index: 1, kind: output, shape index: {}]  }
   0x1   :  { %v101_v0 = vld [vmem:[%s207_s0 + $0xf] sm:$0x1]   ;;  %v103_v1 = vld [vmem:[%s207_s0 + $0xd] sm:$0x1]   ;;  %v102_v2 = vld [vmem:[%s207_s0 + $0xe] sm:$0x1]  }
   0x2   :  { %7 = vrot.lane.b32.xlu0 %v101_v0, %s131_s10  ;;  %19 = vrot.lane.b32.xlu1 %v103_v1, %s132_s11  ;;  %v104_v3 = vld [vmem:[%s207_s0 + $0xc] sm:$0x1]   ;;  %s133_s16 = smov 112   ;;  %s134_s17 = smov 96   ;;  %v105_v4 = vld [vmem:[%s207_s0 + $0xb] sm:$0x1]  }
   0x3   :  { %v106_v5 = vld [vmem:[%s207_s0 + $0xa] sm:$0x1]   ;;  %v2_v6 = vld [vmem:[%s207_s0] sm:$0x1]   ;;  %s135_s24 = smov 88   ;;  %s136_s25 = smov 80  }
   0x4   :  { %4 = vst.msk [vmem:[#allocation0] sm:$0x1] %vm3_vm0, %v2_v6   ;;  %v107_v7 = vld [vmem:[%s207_s0 + $0x9] sm:$0x1]   ;;  %v108_v8 = vld [vmem:[%s207_s0 + $0x8] sm:$0x1]  }
   0x5   :  { %s137_s30 = smov 72   ;;  %s138_s2 = smov 64   ;;  %v109_v9 = vld [vmem:[%s207_s0 + $0x7] sm:$0x1]   ;;  %v110_v10 = vld [vmem:[%s207_s0 + $0x6] sm:$0x1]  }
   0x6   :  { %13 = vrot.lane.b32.xlu0 %v102_v2, %s133_s16  ;;  %25 = vrot.lane.b32.xlu1 %v104_v3, %s134_s17  ;;  %s139_s7 = smov 56   ;;  %s140_s8 = smov 48   ;;  %v111_v11 = vld [vmem:[%s207_s0 + $0x5] sm:$0x1]   ;;  %v112_v12 = vld [vmem:[%s207_s0 + $0x4] sm:$0x1]  }
   0x7   :  { %s141_s13 = smov 40   ;;  %s142_s14 = smov 32   ;;  %v113_v13 = vld [vmem:[%s207_s0 + $0x3] sm:$0x1]   ;;  %v114_v14 = vld [vmem:[%s207_s0 + $0x2] sm:$0x1]  }
   0x8   :  { %s143_s19 = smov 24   ;;  %s144_s20 = smov 16   ;;  %v115_v15 = vld [vmem:[%s207_s0 + $0x1] sm:$0x1]   ;;  %vm27_vm4 = vcmask 851712   ;;  %vm33_vm5 = vcmask 786112  }
   0x9   :  { %s145_s0 = smov 8   ;;  %vm39_vm6 = vcmask 720512   ;;  %vm45_vm7 = vcmask 654912   ;;  %vm51_vm8 = vcmask 589312   ;;  %vm57_vm9 = vcmask 523712  }
   0xa   :  { %31 = vrot.lane.b32.xlu0 %v105_v4, %s135_s24  ;;  %37 = vrot.lane.b32.xlu1 %v106_v5, %s136_s25  ;;  %vm63_vm10 = vcmask 458112   ;;  %vm69_vm11 = vcmask 392512   ;;  %vm75_vm12 = vcmask 326912   ;;  %vm81_vm13 = vcmask 261312  }
   0xb   :  { %vm87_vm14 = vcmask 195712   ;;  %vm93_vm15 = vcmask 130112  }
   0xe   :  { %43 = vrot.lane.b32.xlu0 %v107_v7, %s137_s30  ;;  %49 = vrot.lane.b32.xlu1 %v108_v8, %s138_s2 }
  0x12   :  { %55 = vrot.lane.b32.xlu0 %v109_v9, %s139_s7  ;;  %61 = vrot.lane.b32.xlu1 %v110_v10, %s140_s8 }
  0x16   :  { %67 = vrot.lane.b32.xlu0 %v111_v11, %s141_s13  ;;  %73 = vrot.lane.b32.xlu1 %v112_v12, %s142_s14 }
  0x1a   :  { %79 = vrot.lane.b32.xlu0 %v113_v13, %s143_s19  ;;  %85 = vrot.lane.b32.xlu1 %v114_v14, %s144_s20 }
  0x1e   :  { %91 = vrot.lane.b32.xlu0 %v115_v15, %s145_s0 }
  0x74   :  { %v8_v16 = vpop.permute.xlu0 %7   ;;  %v20_v17 = vpop.permute.xlu1 %19  }
  0x75   :  { %10 = vst.msk [vmem:[#allocation0] sm:$0x1] %vm9_vm1, %v8_v16  }
  0x78   :  { %v14_v18 = vpop.permute.xlu0 %13   ;;  %v26_v19 = vpop.permute.xlu1 %25  }
  0x79   :  { %16 = vst.msk [vmem:[#allocation0] sm:$0x1] %vm15_vm2, %v14_v18  }
  0x7a   :  { %22 = vst.msk [vmem:[#allocation0] sm:$0x1] %vm21_vm3, %v20_v17  }
  0x7b   :  { %28 = vst.msk [vmem:[#allocation0] sm:$0x1] %vm27_vm4, %v26_v19  }
  0x7c   :  { %v32_v20 = vpop.permute.xlu0 %31   ;;  %v38_v21 = vpop.permute.xlu1 %37  }
  0x7d   :  { %34 = vst.msk [vmem:[#allocation0] sm:$0x1] %vm33_vm5, %v32_v20  }
  0x7e   :  { %40 = vst.msk [vmem:[#allocation0] sm:$0x1] %vm39_vm6, %v38_v21  }
  0x80   :  { %v44_v22 = vpop.permute.xlu0 %43   ;;  %v50_v23 = vpop.permute.xlu1 %49  }
  0x81   :  { %46 = vst.msk [vmem:[#allocation0] sm:$0x1] %vm45_vm7, %v44_v22  }
  0x82   :  { %52 = vst.msk [vmem:[#allocation0] sm:$0x1] %vm51_vm8, %v50_v23  }
  0x84   :  { %v56_v24 = vpop.permute.xlu0 %55   ;;  %v62_v25 = vpop.permute.xlu1 %61  }
  0x85   :  { %58 = vst.msk [vmem:[#allocation0] sm:$0x1] %vm57_vm9, %v56_v24  }
  0x86   :  { %64 = vst.msk [vmem:[#allocation0] sm:$0x1] %vm63_vm10, %v62_v25  }
  0x88   :  { %v68_v26 = vpop.permute.xlu0 %67   ;;  %v74_v27 = vpop.permute.xlu1 %73  }
  0x89   :  { %70 = vst.msk [vmem:[#allocation0] sm:$0x1] %vm69_vm11, %v68_v26  }
  0x8a   :  { %76 = vst.msk [vmem:[#allocation0] sm:$0x1] %vm75_vm12, %v74_v27  }
  0x8c   :  { %v80_v28 = vpop.permute.xlu0 %79   ;;  %v86_v29 = vpop.permute.xlu1 %85  }
  0x8d   :  { %82 = vst.msk [vmem:[#allocation0] sm:$0x1] %vm81_vm13, %v80_v28  }
  0x8e   :  { %88 = vst.msk [vmem:[#allocation0] sm:$0x1] %vm87_vm14, %v86_v29  }
  0x90   :  { %v92_v30 = vpop.permute.xlu0 %91  }
  0x91   :  { %94 = vst.msk [vmem:[#allocation0] sm:$0x1] %vm93_vm15, %v92_v30  }
  0x98   :  { %v98_v31 = vld [vmem:[#allocation0] sm:$0x1] }
  0x99   :  { %100 = vst [vmem:[%s208_s1] sm:$0x1] %v98_v31 }

// kernel: relu_conv_bn.1
= control target key start
LH: loop header
LB: loop body
LE: loop exit
PB: predicated region body
PF: predicated region fallthrough
CT: control target
= control target key end

     0   :  { %s664_s12 = smov 0   ;;  %s758_s0 = inlined_call_operand.vmem [shape: f32[2,16,64], index: 0, kind: input, shape index: {}]   ;;  %s759_s1 = inlined_call_operand.vmem [shape: bf16[3,64,128], index: 1, kind: input, shape index: {}]   ;;  %s760_s2 = inlined_call_operand.vmem [shape: f32[2,128], index: 2, kind: input, shape index: {}]   ;;  %s761_s3 = inlined_call_operand.vmem [shape: f32[2,16,128], index: 3, kind: output, shape index: {}]  }
   0x1 LB: > { %s509_s13 = sadd.s32 4294967295, %s640_s12   ;;  %p513_p0 = scmp.ge.s32.totalorder %s640_s12, 1  ;;  %s640_s12 = sphi %s664_s12, %s13_s12  }
   0x2   : > { %p137_p1 = scmp.lt.s32.totalorder %s640_s12, 3 }
   0x4   : > { %p138_p2 = pnand %p513_p0, %p137_p1 }
   0x5   : > { %v622_v0 = vld [vmem:[%s759_s1] sm:$0xff] (!%p138_p2)   ;;  %v642_v1 = vmov (!%p138_p2), 0.0   ;;  %v623_v2 = vld [vmem:[%s759_s1 + $0x8] sm:$0xff] (!%p138_p2)   ;;  %vm643_vm0 = vmmov (!%p138_p2), 0   ;;  %p161_p3 = scmp.lt.s32.totalorder (!%p138_p2), %s509_s13, 1  ;;  %vm172_vm1 = vcmask (!%p138_p2), 523264  }
   0x6   : > { %141 = sbr.rel (%p138_p2) target bundleno = 266 (0x10a), region = 32  ;;  %582 = vmatprep.subr.bf16.mxu0 (!%p138_p2), %v642_v1  ;;  %570 = vmatprep.subr.bf16.mxu1 (!%p138_p2), %v642_v1  ;;  %v626_v3 = vld [vmem:[%s759_s1 + $0x20] sm:$0xff] (!%p138_p2)   ;;  %173 = vst.msk [vmem:[#allocation2] sm:$0xff] (!%p138_p2), %vm172_vm1, %v642_v1  ;;  %174 = vst.msk [vmem:[#allocation2 + $0x8] sm:$0xff] (!%p138_p2), %vm172_vm1, %v642_v1  ;;  %v624_v4 = vld [vmem:[%s759_s1 + $0x10] sm:$0xff] (!%p138_p2)   ;;  %vm175_vm2 = vcmask (!%p138_p2), 517120  }
   0x7   : > { %583 = vmatpush3.bf16.msra.mxu0 (!%p138_p2), %v622_v0  ;;  %590 = vmatprep.mubr.msk.bf16.mxu0 (!%p138_p2), %vm643_vm0, %v642_v1  ;;  %176 = vst.msk [vmem:[#allocation2 + $0x10] sm:$0x3] (!%p138_p2), %vm175_vm2, %v642_v1  ;;  %v628_v5 = vld [vmem:[%s759_s1 + $0x28] sm:$0xff] (!%p138_p2)   ;;  %v625_v8 = vld [vmem:[%s759_s1 + $0x18] sm:$0xff] (!%p138_p2)   ;;  %v630_v11 = vld [vmem:[%s759_s1 + $0x30] sm:$0xff] (!%p138_p2)   ;;  %vm366_vm4 = vcmask (!%p138_p2), 1046528  }
   0x8   : > { %584 = vmatprep.subr.bf16.mxu0 (!%p138_p2), %v642_v1  ;;  %578 = vmatprep.mubr.msk.bf16.mxu1 (!%p138_p2), %vm643_vm0, %v642_v1  ;;  %v632_v12 = vld [vmem:[%s759_s1 + $0x38] sm:$0xff] (!%p138_p2)   ;;  %v627_v13 = vld [vmem:[%s759_s1 + $0x40] sm:$0xff] (!%p138_p2)   ;;  %v629_v22 = vld [vmem:[%s759_s1 + $0x48] sm:$0xff] (!%p138_p2)   ;;  %vm207_vm3 = vsmask.f32 (!%p138_p2), 7424 }
   0x9   : > { %571 = vmatpush3.bf16.msra.mxu1 (!%p138_p2), %v626_v3  ;;  %v631_v26 = vld [vmem:[%s759_s1 + $0x50] sm:$0xff] (!%p138_p2)   ;;  %v633_v28 = vld [vmem:[%s759_s1 + $0x58] sm:$0xff] (!%p138_p2)   ;;  %v549_v36 = vld [vmem:[%s760_s2] ss:$0 sm:$0xff] (!%p138_p2) }
   0xa   : > { %572 = vmatprep.subr.bf16.mxu1 (!%p138_p2), %v642_v1  ;;  %v550_v40 = vld [vmem:[%s760_s2 + $0x1] ss:$0 sm:$0xff] (!%p138_p2) }
   0xb   : > { %585 = vmatpush3.bf16.msra.mxu0 (!%p138_p2), %v623_v2 }
   0xc   : > { %586 = vmatprep.subr.bf16.mxu0 (!%p138_p2), %v642_v1 }
   0xd   : > { %s763_s13 = smov (!%p161_p3, %s509_s13), 1  ;;  %573 = vmatpush3.bf16.msra.mxu1 %v628_v5 }
   0xe   : > { %s553_s22 = sshll.u32 %s763_s13, 4  ;;  %574 = vmatprep.subr.bf16.mxu1 %v642_v1 }
   0xf   : > { %s165_s27 = scalar_lea.vmem %s758_s0, %s553_s22  ;;  %587 = vmatpush3.bf16.msra.mxu0 %v624_v4  ;;  %s170_s24 = scalar_lea.vmem %s761_s3, %s553_s22 }
  0x10   : > { %v177_v6 = vld [vmem:[%s165_s27] sm:$0xff]  ;;  %v178_v7 = vld [vmem:[%s165_s27 + $0x8] sm:$0xff]  ;;  %588 = vmatprep.subr.bf16.mxu0 %v642_v1 }
  0x11   : > { %v179_v9 = vmax.f32 %v177_v6, 0.0  ;;  %v180_v10 = vmax.f32 %v178_v7, 0.0  ;;  %575 = vmatpush3.bf16.msra.mxu1 %v630_v11 }
  0x12   : > { %576 = vmatprep.subr.bf16.mxu1 %v642_v1 }
  0x13   : > { %181 = vst.msk [vmem:[#allocation2 + $0x1] sm:$0xff] %vm172_vm1, %v179_v9  ;;  %182 = vst.msk [vmem:[#allocation2 + $0x9] sm:$0xff] %vm172_vm1, %v180_v10  ;;  %589 = vmatpush3.bf16.msra.mxu0 %v625_v8 }
  0x14   : > { %594 = vmatprep.subr.bf16.mxu0 %v642_v1 }
  0x15   : > { %577 = vmatpush3.bf16.msra.mxu1 %v632_v12 }
  0x1a   : > { %v183_v14 = vld [vmem:[#allocation2] sm:$0xff]  ;;  %v184_v15 = vld [vmem:[#allocation2 + $0x8] sm:$0xff]  ;;  %v185_v16 = vld [vmem:[#allocation2 + $0x10] sm:$0x3] }
  0x1b   : > { %v186_v17 = vpack.c.bf16 %v184_v15, %v183_v14  ;;  %v187_v18 = vpack.c.bf16 %v185_v16, %v185_v16 }
  0x1d   : > { %591 = vmatmul.mubr.msk.bf16.vlgmr.msra.gmra.mrb[0].mxu0 %vm172_vm1, %v186_v17  ;;  %v209_v19 = vshrl.u32 %v186_v17, 16  ;;  %v211_v20 = vshll.u32 %v186_v17, 16  ;;  %v216_v21 = vshll.u32 %v187_v18, 16  ;;  %v367_v29 = vrot.slane %v186_v17, 1 }
  0x1e   : > { %595 = vmatpush3.bf16.msra.mxu0 %v627_v13  ;;  %602 = vmatprep.mubr.msk.bf16.mxu0 %vm643_vm0, %v642_v1  ;;  %v368_v30 = vrot.slane %v187_v18, 1 }
  0x1f   : > { %596 = vmatprep.subr.bf16.mxu0 %v642_v1  ;;  %v213_v23 = vrot.slane %v211_v20, 1  ;;  %v218_v24 = vrot.slane %v216_v21, 1 }
  0x20   : > { %v369_v31 = vsel %vm366_vm4, %v367_v29, %v368_v30 }
  0x21   : > { %v214_v25 = vor.u32 %v213_v23, %v209_v19 }
  0x22   : > { %597 = vmatpush3.bf16.msra.mxu0 %v629_v22 }
  0x23   : > { %598 = vmatprep.subr.bf16.mxu0 %v642_v1  ;;  %v219_v27 = vsel %vm207_vm3, %v214_v25, %v218_v24 }
  0x24   : > { %579 = vmatmul.mubr.msk.bf16.vlgmr.msra.gmra.mrb[0].mxu1 %vm172_vm1, %v219_v27 }
  0x26   : > { %599 = vmatpush3.bf16.msra.mxu0 %v631_v26 }
  0x27   : > { %600 = vmatprep.subr.bf16.mxu0 %v642_v1 }
  0x2a   : > { %601 = vmatpush3.bf16.msra.mxu0 %v633_v28 }
  0x2d   : > { %603 = vmatmul.mubr.msk.bf16.vlgmr.msra.gmra.mrb[0].mxu0 %vm172_vm1, %v369_v31 }
  0xf7   : > { %v281_v32 = vpop.f32.mrb[0].mxu1 }
  0xf8   : > { %v580_v33 = vpop.f32.mrb[1].mxu1 }
  0xf9   : > { %v284_v34 = vpop.f32.mrb[2].mxu1 }
  0xfa   : > { %v581_v35 = vpop.f32.mrb[3].mxu1 }
 0x100   : > { %v431_v37 = vpop.f32.mrb[0].mxu0 }
 0x101   : > { %v606_v38 = vadd.f32 %v431_v37, %v281_v32  ;;  %v604_v39 = vpop.f32.mrb[1].mxu0 }
 0x102   : > { %v434_v41 = vpop.f32.mrb[2].mxu0 }
 0x103   : > { %v444_v42 = vmul.f32 %v606_v38, %v549_v36  ;;  %v607_v43 = vadd.f32 %v434_v41, %v284_v34  ;;  %v605_v44 = vpop.f32.mrb[3].mxu0 }
 0x105   : > { %v450_v45 = vadd.f32 %v550_v40, %v444_v42  ;;  %v445_v46 = vmul.f32 %v607_v43, %v549_v36 }
 0x107   : > { %452 = vst [vmem:[%s170_s24] sm:$0xff] %v450_v45  ;;  %v451_v47 = vadd.f32 %v550_v40, %v445_v46 }
 0x109   : > { %453 = vst [vmem:[%s170_s24 + $0x8] sm:$0xff] %v451_v47 }
 0x10a PF: > { %s13_s12 = sadd.s32 1, %s640_s12  }
 0x10b   : > { %p10_p4 = scmp.ge.s32.totalorder %s13_s12, 4  }
 0x10d   :  { %12 = sbr.rel (!%p10_p4) target bundleno = 1 (0x1), region = 64 }

</bundles_post_ra>
